<compile_context>
chip_gen: v7x
topology: tpu7x:2x2x1
jax: 0.10.0
libtpu: 0.0.40
codegen_flags: <defaults>
</compile_context>

<pallas_src>
import functools

import jax
import jax.numpy as jnp
from jax.experimental import pallas as pl
from jax.experimental.pallas import tpu as pltpu

N_FEATURES = 100
N_OUT = 27
DIMS = [(N_FEATURES, 64), (64, 128), (128, 256), (256, N_OUT)]


def _leaky_relu(x, slope=0.2):
    return jnp.where(x > 0, x, slope * x)


def _round_up(n, m):
    return ((n + m - 1) // m) * m


def _pick_tile_b(B, max_tile):
    """Return (tile_b, B_pad).

    Guarantees: tile_b divides B_pad, and tile_b is either the full padded
    extent or a multiple of 128 (required for the lane-dense transposed output
    block). Prefers a tile that divides B exactly so no jnp.pad copy is needed.
    """
    B8 = _round_up(B, 8)
    if B8 <= max_tile:
        # Single-tile regime. If the batch is big enough, split in two so both
        # v7x TensorCores get work (tile stays a 128-multiple).
        if B8 >= 1024 and B8 % 256 == 0:
            return B8 // 2, B8
        return B8, B8
    # Large batch: search 128-multiple tiles <= max_tile that divide B exactly
    # (skips the pad copy and keeps >=2 grid steps).
    max_tile = max(256, (max_tile // 128) * 128)
    for t in range(max_tile, 255, -128):
        if B % t == 0:
            return t, B
    return max_tile, _round_up(B, max_tile)


def generator_kernel(x_ref, w0_ref, b0_ref, w1_ref, b1_ref,
                     w2_ref, b2_ref, w3_ref, b3_ref, o_ref):
    # x arrives f32 from HBM; cast to bf16 on the VPU (slack), matmuls on MXU
    # with f32 accumulation.
    x = x_ref[...].astype(jnp.bfloat16)

    # hidden0: Linear(100 -> 64) + LeakyReLU(0.2)
    h = jnp.dot(x, w0_ref[...], preferred_element_type=jnp.float32)
    h = _leaky_relu(h + b0_ref[...])
    # hidden1: Linear(64 -> 128) + LeakyReLU(0.2)
    h = jnp.dot(h.astype(jnp.bfloat16), w1_ref[...],
                preferred_element_type=jnp.float32)
    h = _leaky_relu(h + b1_ref[...])
    # hidden2: Linear(128 -> 256) + LeakyReLU(0.2)
    h = jnp.dot(h.astype(jnp.bfloat16), w2_ref[...],
                preferred_element_type=jnp.float32)
    h = _leaky_relu(h + b2_ref[...])
    # out: Linear(256 -> 27) + Tanh
    y = jnp.dot(h.astype(jnp.bfloat16), w3_ref[...],
                preferred_element_type=jnp.float32) + b3_ref[...]
    y = jnp.tanh(y)                                   # (tile_b, 27) f32
    # Lane-dense bf16 store: (N_OUT, tile_b) block, last dim a 128-multiple
    # (or the full padded extent), instead of 27-lane masked partial stores.
    o_ref[...] = jnp.transpose(y).astype(o_ref.dtype)


@functools.partial(jax.jit, static_argnames=("tile_b",))
def generator_forward(x, params, tile_b=2048):
    """x: (B, 100) float32. Returns (B, 27) bfloat16 (tanh output)."""
    B = x.shape[0]
    tile, B_pad = _pick_tile_b(B, tile_b)
    if B_pad != B:
        x = jnp.pad(x, ((0, B_pad - B), (0, 0)))      # only when unavoidable

    w0, b0 = params["w0"], params["b0"]
    w1, b1 = params["w1"], params["b1"]
    w2, b2 = params["w2"], params["b2"]
    w3, b3 = params["w3"], params["b3"]

    grid = (B_pad // tile,)

    # Weights/biases: full-extent blocks, constant index_map -> fetched once,
    # VMEM-resident across all batch tiles (~70 KB total).
    resident = lambda arr: pl.BlockSpec(arr.shape, lambda i: (0, 0))

    param_bytes = sum(int(a.size) * a.dtype.itemsize
                      for a in (w0, b0, w1, b1, w2, b2, w3, b3))
    flops = 2 * B_pad * sum(fi * fo for fi, fo in DIMS)
    bytes_accessed = (B_pad * N_FEATURES * 4      # f32 x (native dtype DMA)
                      + B_pad * N_OUT * 2         # bf16 out
                      + param_bytes)
    cost = pl.CostEstimate(flops=flops,
                           transcendentals=B_pad * N_OUT,   # tanh
                           bytes_accessed=bytes_accessed)

    cp_kwargs = dict(dimension_semantics=("parallel",))
    if tile > 1024:
        # v5e scoped-VMEM default is 16 MiB; large tiles need more headroom.
        cp_kwargs["vmem_limit_bytes"] = 48 * 1024 * 1024

    out = pl.pallas_call(
        generator_kernel,
        out_shape=jax.ShapeDtypeStruct((N_OUT, B_pad), jnp.bfloat16),
        grid=grid,
        in_specs=[
            pl.BlockSpec((tile, N_FEATURES), lambda i: (i, 0)),
            resident(w0), resident(b0),
            resident(w1), resident(b1),
            resident(w2), resident(b2),
            resident(w3), resident(b3),
        ],
        out_specs=pl.BlockSpec((N_OUT, tile), lambda i: (0, i)),
        compiler_params=pltpu.CompilerParams(**cp_kwargs),
        cost_estimate=cost,
    )(x, w0, b0, w1, b1, w2, b2, w3, b3)

    # Undo the lane-dense transpose and strip batch padding (layout plumbing
    # handled by XLA; cheap relative to in-kernel masked stores).
    return out[:, :B].T


def init_params(key):
    """PyTorch-style nn.Linear init; weights stored pre-transposed to
    (in_features, out_features) in bf16, biases (1, out_features) in f32."""
    params = {}
    for i, (fan_in, fan_out) in enumerate(DIMS):
        key, kw, kb = jax.random.split(key, 3)
        bound = 1.0 / jnp.sqrt(fan_in)
        params[f"w{i}"] = jax.random.uniform(
            kw, (fan_in, fan_out), jnp.float32, -bound, bound
        ).astype(jnp.bfloat16)
        params[f"b{i}"] = jax.random.uniform(
            kb, (1, fan_out), jnp.float32, -bound, bound)
    return params


def reference_forward(x, params):
    """Plain-JAX reference with identical bf16-in / f32-accumulate numerics."""
    h = x.astype(jnp.bfloat16)
    for i in range(3):
        h = jnp.dot(h, params[f"w{i}"],
                    preferred_element_type=jnp.float32) + params[f"b{i}"]
        h = jnp.where(h > 0, h, 0.2 * h).astype(jnp.bfloat16)
    y = jnp.dot(h, params["w3"],
                preferred_element_type=jnp.float32) + params["b3"]
    return jnp.tanh(y)


if __name__ == "__main__":
    key = jax.random.PRNGKey(0)
    key, kx = jax.random.split(key)
    batch = 8
    x = jax.random.normal(kx, (batch, N_FEATURES), jnp.float32)
    params = init_params(key)

    out = generator_forward(x, params)
    jax.block_until_ready(out)

    ref = reference_forward(x, params)
    assert out.shape == (batch, N_OUT)
    out_f32 = out.astype(jnp.float32)
    assert bool(jnp.all(jnp.abs(out_f32) <= 1.0 + 1e-3))   # tanh range
    # bf16 output quantization adds ~4e-3 absolute error near |y|~1.
    assert jnp.allclose(out_f32, ref, atol=1.5e-2, rtol=1.5e-2), \
        float(jnp.max(jnp.abs(out_f32 - ref)))

    print("KERNEL_OK")
</pallas_src>

<mosaic_0001>
module attributes {stable_mosaic.version = 11 : i64} {
  func.func @generator_kernel(%arg0: i32, %arg1: memref<8x100xf32, #tpu.memory_space<vmem>>, %arg2: memref<100x64xbf16, #tpu.memory_space<vmem>>, %arg3: memref<1x64xf32, #tpu.memory_space<vmem>>, %arg4: memref<64x128xbf16, #tpu.memory_space<vmem>>, %arg5: memref<1x128xf32, #tpu.memory_space<vmem>>, %arg6: memref<128x256xbf16, #tpu.memory_space<vmem>>, %arg7: memref<1x256xf32, #tpu.memory_space<vmem>>, %arg8: memref<256x27xbf16, #tpu.memory_space<vmem>>, %arg9: memref<1x27xf32, #tpu.memory_space<vmem>>, %arg10: memref<27x8xbf16, #tpu.memory_space<vmem>>) attributes {dimension_semantics = [#tpu.dimension_semantics<parallel>], iteration_bounds = array<i64: 1>, scalar_prefetch = 0 : i64, scratch_operands = 0 : i64, tpu.core_type = #tpu.core_type<tc>, window_params = [{transform_indices = @transform_0, window_bounds = array<i64: 8, 100>}, {pipeline_mode = #tpu.pipeline_mode<synchronous>, transform_indices = @transform_1, window_bounds = array<i64: 100, 64>}, {pipeline_mode = #tpu.pipeline_mode<synchronous>, transform_indices = @transform_2, window_bounds = array<i64: 1, 64>}, {pipeline_mode = #tpu.pipeline_mode<synchronous>, transform_indices = @transform_3, window_bounds = array<i64: 64, 128>}, {pipeline_mode = #tpu.pipeline_mode<synchronous>, transform_indices = @transform_4, window_bounds = array<i64: 1, 128>}, {pipeline_mode = #tpu.pipeline_mode<synchronous>, transform_indices = @transform_5, window_bounds = array<i64: 128, 256>}, {pipeline_mode = #tpu.pipeline_mode<synchronous>, transform_indices = @transform_6, window_bounds = array<i64: 1, 256>}, {pipeline_mode = #tpu.pipeline_mode<synchronous>, transform_indices = @transform_7, window_bounds = array<i64: 256, 27>}, {pipeline_mode = #tpu.pipeline_mode<synchronous>, transform_indices = @transform_8, window_bounds = array<i64: 1, 27>}, {transform_indices = @transform_9, window_bounds = array<i64: 27, 8>}]} {
    %c0 = arith.constant 0 : index
    %c0_0 = arith.constant 0 : index
    %0 = vector.load %arg1[%c0, %c0_0] : memref<8x100xf32, #tpu.memory_space<vmem>>, vector<8x100xf32>
    %1 = arith.truncf %0 : vector<8x100xf32> to vector<8x100xbf16>
    %c0_1 = arith.constant 0 : index
    %c0_2 = arith.constant 0 : index
    %2 = vector.load %arg2[%c0_1, %c0_2] : memref<100x64xbf16, #tpu.memory_space<vmem>>, vector<100x64xbf16>
    %cst = arith.constant dense<0.000000e+00> : vector<8x64xf32>
    %3 = tpu.matmul %1, %2, %cst {dimension_numbers = #tpu.dot_dimension_numbers<[1], [0], [0], [1], [0, 0, 1, 1], [], []>} : vector<8x100xbf16>, vector<100x64xbf16>, vector<8x64xf32> -> vector<8x64xf32>
    %c0_3 = arith.constant 0 : index
    %c0_4 = arith.constant 0 : index
    %4 = vector.load %arg3[%c0_3, %c0_4] : memref<1x64xf32, #tpu.memory_space<vmem>>, vector<1x64xf32>
    %5 = vector.broadcast %4 : vector<1x64xf32> to vector<8x64xf32>
    %6 = arith.addf %3, %5 : vector<8x64xf32>
    %cst_5 = arith.constant 0.000000e+00 : f32
    %7 = vector.broadcast %cst_5 : f32 to vector<8x64xf32>
    %8 = arith.cmpf ogt, %6, %7 : vector<8x64xf32>
    %cst_6 = arith.constant 2.000000e-01 : f32
    %9 = vector.broadcast %cst_6 : f32 to vector<8x64xf32>
    %10 = arith.mulf %9, %6 : vector<8x64xf32>
    %11 = arith.select %8, %6, %10 : vector<8x64xi1>, vector<8x64xf32>
    %12 = arith.truncf %11 : vector<8x64xf32> to vector<8x64xbf16>
    %c0_7 = arith.constant 0 : index
    %c0_8 = arith.constant 0 : index
    %13 = vector.load %arg4[%c0_7, %c0_8] : memref<64x128xbf16, #tpu.memory_space<vmem>>, vector<64x128xbf16>
    %cst_9 = arith.constant dense<0.000000e+00> : vector<8x128xf32>
    %14 = tpu.matmul %12, %13, %cst_9 {dimension_numbers = #tpu.dot_dimension_numbers<[1], [0], [0], [1], [0, 0, 1, 1], [], []>} : vector<8x64xbf16>, vector<64x128xbf16>, vector<8x128xf32> -> vector<8x128xf32>
    %c0_10 = arith.constant 0 : index
    %c0_11 = arith.constant 0 : index
    %15 = vector.load %arg5[%c0_10, %c0_11] : memref<1x128xf32, #tpu.memory_space<vmem>>, vector<1x128xf32>
    %16 = vector.broadcast %15 : vector<1x128xf32> to vector<8x128xf32>
    %17 = arith.addf %14, %16 : vector<8x128xf32>
    %cst_12 = arith.constant 0.000000e+00 : f32
    %18 = vector.broadcast %cst_12 : f32 to vector<8x128xf32>
    %19 = arith.cmpf ogt, %17, %18 : vector<8x128xf32>
    %cst_13 = arith.constant 2.000000e-01 : f32
    %20 = vector.broadcast %cst_13 : f32 to vector<8x128xf32>
    %21 = arith.mulf %20, %17 : vector<8x128xf32>
    %22 = arith.select %19, %17, %21 : vector<8x128xi1>, vector<8x128xf32>
    %23 = arith.truncf %22 : vector<8x128xf32> to vector<8x128xbf16>
    %c0_14 = arith.constant 0 : index
    %c0_15 = arith.constant 0 : index
    %24 = vector.load %arg6[%c0_14, %c0_15] : memref<128x256xbf16, #tpu.memory_space<vmem>>, vector<128x256xbf16>
    %cst_16 = arith.constant dense<0.000000e+00> : vector<8x256xf32>
    %25 = tpu.matmul %23, %24, %cst_16 {dimension_numbers = #tpu.dot_dimension_numbers<[1], [0], [0], [1], [0, 0, 1, 1], [], []>} : vector<8x128xbf16>, vector<128x256xbf16>, vector<8x256xf32> -> vector<8x256xf32>
    %c0_17 = arith.constant 0 : index
    %c0_18 = arith.constant 0 : index
    %26 = vector.load %arg7[%c0_17, %c0_18] : memref<1x256xf32, #tpu.memory_space<vmem>>, vector<1x256xf32>
    %27 = vector.broadcast %26 : vector<1x256xf32> to vector<8x256xf32>
    %28 = arith.addf %25, %27 : vector<8x256xf32>
    %cst_19 = arith.constant 0.000000e+00 : f32
    %29 = vector.broadcast %cst_19 : f32 to vector<8x256xf32>
    %30 = arith.cmpf ogt, %28, %29 : vector<8x256xf32>
    %cst_20 = arith.constant 2.000000e-01 : f32
    %31 = vector.broadcast %cst_20 : f32 to vector<8x256xf32>
    %32 = arith.mulf %31, %28 : vector<8x256xf32>
    %33 = arith.select %30, %28, %32 : vector<8x256xi1>, vector<8x256xf32>
    %34 = arith.truncf %33 : vector<8x256xf32> to vector<8x256xbf16>
    %c0_21 = arith.constant 0 : index
    %c0_22 = arith.constant 0 : index
    %35 = vector.load %arg8[%c0_21, %c0_22] : memref<256x27xbf16, #tpu.memory_space<vmem>>, vector<256x27xbf16>
    %cst_23 = arith.constant dense<0.000000e+00> : vector<8x27xf32>
    %36 = tpu.matmul %34, %35, %cst_23 {dimension_numbers = #tpu.dot_dimension_numbers<[1], [0], [0], [1], [0, 0, 1, 1], [], []>} : vector<8x256xbf16>, vector<256x27xbf16>, vector<8x27xf32> -> vector<8x27xf32>
    %c0_24 = arith.constant 0 : index
    %c0_25 = arith.constant 0 : index
    %37 = vector.load %arg9[%c0_24, %c0_25] : memref<1x27xf32, #tpu.memory_space<vmem>>, vector<1x27xf32>
    %38 = vector.broadcast %37 : vector<1x27xf32> to vector<8x27xf32>
    %39 = arith.addf %36, %38 : vector<8x27xf32>
    %40 = math.tanh %39 : vector<8x27xf32>
    %41 = tpu.transpose %40, [1, 0] : vector<8x27xf32> -> vector<27x8xf32>
    %42 = arith.truncf %41 : vector<27x8xf32> to vector<27x8xbf16>
    %c0_26 = arith.constant 0 : index
    %c0_27 = arith.constant 0 : index
    %43 = vector.load %arg10[%c0_26, %c0_27] : memref<27x8xbf16, #tpu.memory_space<vmem>>, vector<27x8xbf16>
    tpu.vector_store %arg10[%c0_26, %c0_27], %42 {strides = array<i32>} : memref<27x8xbf16, #tpu.memory_space<vmem>>, vector<27x8xbf16>,
    return
  }
  func.func @transform_0(%arg0: i32) -> (i32, i32) {
    %c0_i32 = arith.constant 0 : i32
    %c0_i32_0 = arith.constant 0 : i32
    return %arg0, %c0_i32 : i32, i32
  }
  func.func @transform_1(%arg0: i32) -> (i32, i32) {
    %c0_i32 = arith.constant 0 : i32
    %c0_i32_0 = arith.constant 0 : i32
    %c0_i32_1 = arith.constant 0 : i32
    return %c0_i32, %c0_i32_0 : i32, i32
  }
  func.func @transform_2(%arg0: i32) -> (i32, i32) {
    %c0_i32 = arith.constant 0 : i32
    %c0_i32_0 = arith.constant 0 : i32
    %c0_i32_1 = arith.constant 0 : i32
    return %c0_i32, %c0_i32_0 : i32, i32
  }
  func.func @transform_3(%arg0: i32) -> (i32, i32) {
    %c0_i32 = arith.constant 0 : i32
    %c0_i32_0 = arith.constant 0 : i32
    %c0_i32_1 = arith.constant 0 : i32
    return %c0_i32, %c0_i32_0 : i32, i32
  }
  func.func @transform_4(%arg0: i32) -> (i32, i32) {
    %c0_i32 = arith.constant 0 : i32
    %c0_i32_0 = arith.constant 0 : i32
    %c0_i32_1 = arith.constant 0 : i32
    return %c0_i32, %c0_i32_0 : i32, i32
  }
  func.func @transform_5(%arg0: i32) -> (i32, i32) {
    %c0_i32 = arith.constant 0 : i32
    %c0_i32_0 = arith.constant 0 : i32
    %c0_i32_1 = arith.constant 0 : i32
    return %c0_i32, %c0_i32_0 : i32, i32
  }
  func.func @transform_6(%arg0: i32) -> (i32, i32) {
    %c0_i32 = arith.constant 0 : i32
    %c0_i32_0 = arith.constant 0 : i32
    %c0_i32_1 = arith.constant 0 : i32
    return %c0_i32, %c0_i32_0 : i32, i32
  }
  func.func @transform_7(%arg0: i32) -> (i32, i32) {
    %c0_i32 = arith.constant 0 : i32
    %c0_i32_0 = arith.constant 0 : i32
    %c0_i32_1 = arith.constant 0 : i32
    return %c0_i32, %c0_i32_0 : i32, i32
  }
  func.func @transform_8(%arg0: i32) -> (i32, i32) {
    %c0_i32 = arith.constant 0 : i32
    %c0_i32_0 = arith.constant 0 : i32
    %c0_i32_1 = arith.constant 0 : i32
    return %c0_i32, %c0_i32_0 : i32, i32
  }
  func.func @transform_9(%arg0: i32) -> (i32, i32) {
    %c0_i32 = arith.constant 0 : i32
    %c0_i32_0 = arith.constant 0 : i32
    return %c0_i32, %arg0 : i32, i32
  }
}

</mosaic_0001>

<bundles_post_ra>
// kernel: generator_forward.1
= control target key start
LH: loop header
LB: loop body
LE: loop exit
PB: predicated region body
PF: predicated region fallthrough
CT: control target
= control target key end

     0   :  { %v805_v0 = vmov 0.0   ;;  %vm806_vm0 = vmmov 0   ;;  %vm98_vm1 = vcmask 1041408   ;;  %vm94_vm2 = vcmask 818176   ;;  %s1017_s1 = inlined_call_operand.vmem [shape: bf16[100,64], index: 1, kind: input, shape index: {}]   ;;  %s1018_s3 = inlined_call_operand.vmem [shape: bf16[64,128], index: 3, kind: input, shape index: {}]   ;;  %s1019_s0 = inlined_call_operand.vmem [shape: f32[8,100], index: 0, kind: input, shape index: {}]   ;;  %s1020_s5 = inlined_call_operand.vmem [shape: bf16[128,256], index: 5, kind: input, shape index: {}]   ;;  %s1021_s2 = inlined_call_operand.vmem [shape: f32[1,64], index: 2, kind: input, shape index: {}]   ;;  %s1022_s7 = inlined_call_operand.vmem [shape: bf16[256,27], index: 7, kind: input, shape index: {}]   ;;  %s1023_s4 = inlined_call_operand.vmem [shape: f32[1,128], index: 4, kind: input, shape index: {}]   ;;  %s1024_s6 = inlined_call_operand.vmem [shape: f32[1,256], index: 6, kind: input, shape index: {}]   ;;  %s1025_s8 = inlined_call_operand.vmem [shape: f32[1,27], index: 8, kind: input, shape index: {}]   ;;  %s1026_s9 = inlined_call_operand.vmem [shape: bf16[27,8], index: 9, kind: output, shape index: {}]  }
   0x1   :  { %719 = vmatprep.subr.bf16.mxu0 %v805_v0  ;;  %v752_v1 = vld [vmem:[%s1017_s1] sm:$0xff]   ;;  %733 = vmatprep.mubr.msk.bf16.mxu0 %vm806_vm0, %v805_v0  ;;  %v753_v2 = vld [vmem:[%s1017_s1 + $0x8] sm:$0xff]   ;;  %v754_v3 = vld [vmem:[%s1017_s1 + $0x10] sm:$0xff]   ;;  %vm185_vm4 = vcmask 523264   ;;  %v807_v40 = vmov 0   ;;  %vm614_vm8 = vcmask 60416  }
   0x2   :  { %737 = vmatprep.subr.bf16.mxu1 %v805_v0  ;;  %745 = vmatprep.mubr.msk.bf16.mxu1 %vm806_vm0, %v805_v0  ;;  %v759_v4 = vld [vmem:[%s1018_s3] sm:$0xff]   ;;  %v760_v5 = vld [vmem:[%s1018_s3 + $0x8] sm:$0xff]   ;;  %v755_v6 = vld [vmem:[%s1017_s1 + $0x18] sm:$0xff]   ;;  %vm618_vm9 = vcmask 58368   ;;  %vm619_vm10 = vsmask.f32 1280 }
   0x3   :  { %720 = vmatpush3.bf16.msra.mxu0 %v752_v1  ;;  %738 = vmatpush3.bf16.msra.mxu1 %v759_v4  ;;  %v756_v7 = vld [vmem:[%s1017_s1 + $0x20] sm:$0xff]   ;;  %v757_v8 = vld [vmem:[%s1017_s1 + $0x28] sm:$0xff]   ;;  %v758_v9 = vld [vmem:[%s1017_s1 + $0x30] ss:$0 sps:$4 sm:$0x33]  }
   0x4   :  { %721 = vmatprep.subr.bf16.mxu0 %v805_v0  ;;  %739 = vmatprep.subr.bf16.mxu1 %v805_v0  ;;  %v33_v10 = vld [vmem:[%s1019_s0] sm:$0xff]  ;;  %v100_v11 = vsel %vm98_vm1, %v758_v9, 0  ;;  %v761_v13 = vld [vmem:[%s1018_s3 + $0x10] sm:$0xff]   ;;  %v762_v14 = vld [vmem:[%s1018_s3 + $0x18] sm:$0xff]  }
   0x5   :  { %v34_v12 = vpack.c.bf16 %v33_v10, %v33_v10  ;;  %v765_v15 = vld [vmem:[%s1020_s5 + $0x4] ss:$8 sps:$4 sm:$0xff]   ;;  %v628_v16 = vld [vmem:[%s1021_s2] ss:$0 sm:$0xff]  ;;  %v768_v26 = vld [vmem:[%s1020_s5 + $0x14] ss:$8 sps:$4 sm:$0xff]  }
   0x6   :  { %v763_v24 = vld [vmem:[%s1020_s5] ss:$8 sps:$4 sm:$0xff]   ;;  %v766_v27 = vld [vmem:[%s1020_s5 + $0x10] ss:$8 sps:$4 sm:$0xff]   ;;  %v771_v28 = vld [vmem:[%s1020_s5 + $0x24] ss:$8 sps:$4 sm:$0xff]  }
   0x7   :  { %722 = vmatpush3.bf16.msra.mxu0 %v753_v2  ;;  %740 = vmatpush3.bf16.msra.mxu1 %v760_v5  ;;  %v769_v29 = vld [vmem:[%s1020_s5 + $0x20] ss:$8 sps:$4 sm:$0xff]   ;;  %v774_v30 = vld [vmem:[%s1020_s5 + $0x34] ss:$8 sps:$4 sm:$0xff]   ;;  %v772_v31 = vld [vmem:[%s1020_s5 + $0x30] ss:$8 sps:$4 sm:$0xff]   ;;  %v251_v2 = vlaneseq }
   0x8   :  { %723 = vmatprep.subr.bf16.mxu0 %v805_v0  ;;  %741 = vmatprep.subr.bf16.mxu1 %v805_v0  ;;  %v777_v32 = vld [vmem:[%s1020_s5 + $0x44] ss:$8 sps:$4 sm:$0xff]   ;;  %v775_v33 = vld [vmem:[%s1020_s5 + $0x40] ss:$8 sps:$4 sm:$0xff]   ;;  %v780_v34 = vld [vmem:[%s1020_s5 + $0x54] ss:$8 sps:$4 sm:$0xff]  }
   0x9   :  { %v778_v35 = vld [vmem:[%s1020_s5 + $0x50] ss:$8 sps:$4 sm:$0xff]   ;;  %v783_v36 = vld [vmem:[%s1020_s5 + $0x64] ss:$8 sps:$4 sm:$0xff]   ;;  %v781_v37 = vld [vmem:[%s1020_s5 + $0x60] ss:$8 sps:$4 sm:$0xff]  }
   0xa   :  { %v786_v38 = vld [vmem:[%s1020_s5 + $0x74] ss:$8 sps:$4 sm:$0xff]   ;;  %v784_v39 = vld [vmem:[%s1020_s5 + $0x70] ss:$8 sps:$4 sm:$0xff]   ;;  %v787_v41 = vld [vmem:[%s1022_s7 + $0x40] sm:$0xff]  }
   0xb   :  { %724 = vmatpush3.bf16.msra.mxu0 %v754_v3  ;;  %742 = vmatpush3.bf16.msra.mxu1 %v761_v13  ;;  %v788_v42 = vld [vmem:[%s1022_s7] sm:$0xff]   ;;  %v789_v43 = vld [vmem:[%s1022_s7 + $0x48] sm:$0xff]   ;;  %v791_v45 = vld [vmem:[%s1022_s7 + $0x50] sm:$0xff]   ;;  %v252_v3 = vshrl.u32 %v251_v2, 7 }
   0xc   :  { %725 = vmatprep.subr.bf16.mxu0 %v805_v0  ;;  %743 = vmatprep.subr.bf16.mxu1 %v805_v0  ;;  %v790_v44 = vld [vmem:[%s1022_s7 + $0x8] sm:$0xff]   ;;  %v792_v46 = vld [vmem:[%s1022_s7 + $0x10] sm:$0xff]   ;;  %v793_v47 = vld [vmem:[%s1022_s7 + $0x58] sm:$0xff]  }
   0xd   :  { %v794_v48 = vld [vmem:[%s1022_s7 + $0x18] sm:$0xff]   ;;  %v795_v49 = vld [vmem:[%s1022_s7 + $0x60] sm:$0xff]   ;;  %v797_v51 = vld [vmem:[%s1022_s7 + $0x68] sm:$0xff]   ;;  %v253_v4 = vsub.s32 0, %v252_v3 }
   0xe   :  { %v796_v50 = vld [vmem:[%s1022_s7 + $0x20] sm:$0xff]   ;;  %v798_v52 = vld [vmem:[%s1022_s7 + $0x28] sm:$0xff]   ;;  %v799_v62 = vld [vmem:[%s1022_s7 + $0x70] sm:$0xff]  }
   0xf   :  { %726 = vmatpush3.bf16.msra.mxu0 %v755_v6  ;;  %744 = vmatpush3.bf16.msra.mxu1 %v762_v14  ;;  %v637_v53 = vld [vmem:[%s1023_s4] ss:$0 sm:$0xff]  ;;  %v800_v63 = vld [vmem:[%s1022_s7 + $0x30] sm:$0xff]   ;;  %v802_v1 = vld [vmem:[%s1022_s7 + $0x38] sm:$0xff]   ;;  %v257_v6 = vsub.s32 1, %v252_v3 }
  0x10   :  { %727 = vmatprep.subr.bf16.mxu0 %v805_v0  ;;  %341 = vmatprep.subr.bf16.mxu1 %v765_v15  ;;  %v249_v5 = vld [vmem:[%s1024_s6] sm:$0x3]  ;;  %vm620_vm11 = vmand %vm618_vm9, %vm619_vm10 }
  0x13   :  { %728 = vmatpush3.bf16.msra.mxu0 %v756_v7  ;;  %v254_v7 = vrot.slane %v249_v5, %v253_v4 }
  0x14   :  { %729 = vmatprep.subr.bf16.mxu0 %v805_v0 }
  0x17   :  { %730 = vmatpush3.bf16.msra.mxu0 %v757_v8  ;;  %v258_v8 = vrot.slane %v249_v5, %v257_v6 }
  0x18   :  { %731 = vmatprep.subr.bf16.mxu0 %v805_v0  ;;  %v801_v0 = vld [vmem:[%s1022_s7 + $0x78] sm:$0xff]  }
  0x1b   :  { %732 = vmatpush3.bf16.msra.mxu0 %v100_v11 }
  0x1c   :  { %697 = vmatprep.subr.bf16.mxu0 %v787_v41 }
  0x1e   :  { %734 = vmatmul.mubr.msk.bf16.vlgmr.msra.gmra.mrb[0].mxu0 %vm94_vm2, %v34_v12 }
  0x1f   :  { %698 = vmatpush3.bf16.msra.mxu0 %v788_v42 }
  0x20   :  { %699 = vmatprep.subr.bf16.mxu0 %v789_v43 }
  0x23   :  { %700 = vmatpush3.bf16.msra.mxu0 %v790_v44 }
  0x24   :  { %701 = vmatprep.subr.bf16.mxu0 %v791_v45 }
  0x27   :  { %702 = vmatpush3.bf16.msra.mxu0 %v792_v46 }
  0x28   :  { %703 = vmatprep.subr.bf16.mxu0 %v793_v47 }
  0x2b   :  { %704 = vmatpush3.bf16.msra.mxu0 %v794_v48 }
  0x2c   :  { %705 = vmatprep.subr.bf16.mxu0 %v795_v49 }
  0x2f   :  { %706 = vmatpush3.bf16.msra.mxu0 %v796_v50 }
  0x30   :  { %707 = vmatprep.subr.bf16.mxu0 %v797_v51 }
  0x33   :  { %708 = vmatpush3.bf16.msra.mxu0 %v798_v52 }
  0x34   :  { %709 = vmatprep.subr.bf16.mxu0 %v799_v62 }
  0x37   :  { %710 = vmatpush3.bf16.msra.mxu0 %v800_v63 }
  0x38   :  { %711 = vmatprep.subr.bf16.mxu0 %v801_v0 }
  0x3b   :  { %712 = vmatpush3.bf16.msra.mxu0 %v802_v1 }
  0xf1   :  { %v136_v17 = vpop.f32.mrb[0].mxu0 }
  0xf2   :  { %v137_v18 = vadd.f32 %v628_v16, %v136_v17  ;;  %v735_v19 = vpop.f32.mrb[1].mxu0 }
  0xf3   :  { %v139_v20 = vpop.f32.mrb[2].mxu0 }
  0xf4   :  { %vm142_vm3 = vcmp.gt.f32.partialorder %v137_v18, 0.0  ;;  %v143_v21 = vmul.f32 0.2, %v137_v18  ;;  %v736_v22 = vpop.f32.mrb[3].mxu0 }
  0xf5   :  { %v659_v22 = vld [vmem:[%s1025_s8] ss:$0 sm:$0xff] }
  0xf6   :  { %v144_v23 = vsel %vm142_vm3, %v137_v18, %v143_v21 }
  0xf7   :  { %v145_v25 = vpack.c.bf16 %v144_v23, %v144_v23 }
  0xf9   :  { %746 = vmatmul.mubr.msk.bf16.vlgmr.msra.gmra.mrb[0].mxu1 %vm185_vm4, %v145_v25 }
  0xfa   :  { %342 = vmatpush1.bf16.msra.mxu1 %v763_v24  ;;  %373 = vmatprep.mubr.bf16.mxu1 %v807_v40 }
  0xfb   :  { %343 = vmatprep.subr.bf16.mxu1 %v768_v26 }
  0xfe   :  { %344 = vmatpush1.bf16.msra.mxu1 %v766_v27 }
  0xff   :  { %345 = vmatprep.subr.bf16.mxu1 %v771_v28 }
 0x102   :  { %346 = vmatpush1.bf16.msra.mxu1 %v769_v29 }
 0x103   :  { %347 = vmatprep.subr.bf16.mxu1 %v774_v30 }
 0x106   :  { %348 = vmatpush1.bf16.msra.mxu1 %v772_v31 }
 0x107   :  { %349 = vmatprep.subr.bf16.mxu1 %v777_v32 }
 0x10a   :  { %350 = vmatpush1.bf16.msra.mxu1 %v775_v33 }
 0x10b   :  { %351 = vmatprep.subr.bf16.mxu1 %v780_v34 }
 0x10e   :  { %352 = vmatpush1.bf16.msra.mxu1 %v778_v35  ;;  %v621_v35 = vld [vmem:[%s1026_s9 + $0xc] sm:$0x3] }
 0x10f   :  { %353 = vmatprep.subr.bf16.mxu1 %v783_v36 }
 0x112   :  { %354 = vmatpush1.bf16.msra.mxu1 %v781_v37 }
 0x113   :  { %355 = vmatprep.subr.bf16.mxu1 %v786_v38 }
 0x116   :  { %356 = vmatpush1.bf16.msra.mxu1 %v784_v39 }
 0x1cc   :  { %v223_v54 = vpop.f32.mrb[0].mxu1 }
 0x1cd   :  { %v224_v55 = vadd.f32 %v637_v53, %v223_v54  ;;  %v747_v56 = vpop.f32.mrb[1].mxu1 }
 0x1ce   :  { %v226_v57 = vpop.f32.mrb[2].mxu1 }
 0x1cf   :  { %vm229_vm5 = vcmp.gt.f32.partialorder %v224_v55, 0.0  ;;  %v230_v58 = vmul.f32 0.2, %v224_v55  ;;  %v748_v59 = vpop.f32.mrb[3].mxu1 }
 0x1d1   :  { %v231_v60 = vsel %vm229_vm5, %v224_v55, %v230_v58 }
 0x1d2   :  { %v232_v61 = vpack.c.bf16 %v231_v60, %v231_v60 }
 0x1d4   :  { %374 = vmatmul.mubr.bf16.vlgmr.msra.gmra.mrb[4].mxu1 %v232_v61 }
 0x2a7   :  { %v375_v9 = vpop.f32.mrb[4].mxu1 }
 0x2a8   :  { %v376_v10 = vadd.f32 %v375_v9, %v254_v7  ;;  %v377_v11 = vpop.f32.mrb[5].mxu1 }
 0x2a9   :  { %v378_v12 = vadd.f32 %v377_v11, %v258_v8  ;;  %v379_v13 = vpop.f32.mrb[6].mxu1 }
 0x2aa   :  { %vm382_vm6 = vcmp.gt.f32.partialorder %v376_v10, 0.0  ;;  %v384_v14 = vmul.f32 0.2, %v376_v10  ;;  %v380_v15 = vpop.f32.mrb[7].mxu1 }
 0x2ab   :  { %vm383_vm7 = vcmp.gt.f32.partialorder %v378_v12, 0.0  ;;  %v385_v16 = vmul.f32 0.2, %v378_v12 }
 0x2ac   :  { %v386_v17 = vsel %vm382_vm6, %v376_v10, %v384_v14 }
 0x2ad   :  { %v387_v18 = vsel %vm383_vm7, %v378_v12, %v385_v16  ;;  %v388_v20 = vpack.c.bf16 %v386_v17, %v386_v17 }
 0x2ae   :  { %v389_v19 = vpack.c.bf16 %v387_v18, %v387_v18 }
 0x2b0   :  { %557 = vmatprep.mubr.bf16.mxu0 %v389_v19 }
 0x2b1   :  { %558 = vmatmul.mubr.bf16.vlgmr.msra.gmra.mrb[4].mxu0 %v388_v20 }
 0x384   :  { %v713_v21 = vpop.f32.mrb[4].mxu0 }
 0x385   :  { %v714_v23 = vpop.f32.mrb[5].mxu0 }
 0x386   :  { %v715_v24 = vadd.f32 %v714_v23, %v713_v21  ;;  %v716_v25 = vpop.f32.mrb[6].mxu0 }
 0x387   :  { %v717_v26 = vpop.f32.mrb[7].mxu0 }
 0x388   :  { %v560_v27 = vadd.f32 %v715_v24, %v659_v22 }
 0x38a   :  { %803 = vtanh.f32 %v560_v27 }
 0x394   :  { %v804_v28 = vpop.eup %803 }
 0x395   :  { %566 = vxpose.xlu0.b32.start.end [1/1] (short) (narrow) %v804_v28, 32 }
 0x415   :  { %v582_v29 = vpop.trf.xlu0 }
 0x416   :  { %v680_v30 = vpack.c.bf16 %v582_v29, %v582_v29 }
 0x418   :  { %615 = vst.msk [vmem:[%s1026_s9] sm:$0xf] %vm614_vm8, %v680_v30 }
 0x419   :  { %v583_v31 = vpop.trf.xlu0 }
 0x41a   :  { %v681_v32 = vpack.c.bf16 %v583_v31, %v583_v31 }
 0x41c   :  { %616 = vst.msk [vmem:[%s1026_s9 + $0x4] sm:$0xf] %vm614_vm8, %v681_v32 }
 0x41d   :  { %v584_v33 = vpop.trf.xlu0 }
 0x41e   :  { %v682_v34 = vpack.c.bf16 %v584_v33, %v584_v33 }
 0x420   :  { %617 = vst.msk [vmem:[%s1026_s9 + $0x8] sm:$0xf] %vm614_vm8, %v682_v34 }
 0x421   :  { %v585_v36 = vpop.trf.xlu0 }
 0x422   :  { %v683_v37 = vpack.c.bf16 %v585_v36, %v585_v36 }
 0x424   :  { %v622_v38 = vsel %vm620_vm11, %v683_v37, %v621_v35 }
 0x425   :  { %623 = vst [vmem:[%s1026_s9 + $0xc] sm:$0x3] %v622_v38 }

</bundles_post_ra>
